<compile_context>
chip_gen: v7x
topology: tpu7x:2x2x1
jax: 0.10.0
libtpu: 0.0.40
codegen_flags: <defaults>
</compile_context>

<pallas_src>
import functools

import jax
import jax.numpy as jnp
from jax.experimental import pallas as pl
from jax.experimental.pallas import tpu as pltpu


def _mish(x):
    """mish(x) = x*tanh(softplus(x)) = x*(e^2 + 2e)/(e^2 + 2e + 2), e = e^x.

    One EUP transcendental (exp) + one divide instead of exp + log1p + tanh.
    Clamping x keeps e*e finite in f32; for x > 20 the ratio is 1.0 to f32
    precision, which matches tanh(softplus(x)) there.
    """
    e = jnp.exp(jnp.minimum(x, 20.0))
    num = e * (e + 2.0)
    return x * (num / (num + 2.0))


def _decoder2_kernel(pos_ref, x_ref, w1_ref, b1_ref, w2_ref, b2_ref,
                     w3_ref, b3_ref, o_ref, *, seg_len, very_bottom):
    """Fused Decoder2 forward on one lane-packed batch group.

    pos_ref: (1, N) int32        lane index modulo seg_len (N = segs*seg_len)
    x_ref  : (Cp, N) f32         channels on sublanes, batch*length on lanes
    w1_ref : (H, 3*Cp) bf16      conv1 tap-major        b1_ref: (H, 1) f32
    w2_ref : (H, 2*H) bf16       conv2, x2-upsample folded, rows [even; odd]
    b2_ref : (H/2, 1) f32
    w3_ref : (2*Cout, 2*H) bf16  conv3 on the de-interleaved even/odd stream
    b3_ref : (2*Cout, 1) f32
    o_ref  : (2*Cout, N) f32     rows [:Cout] = even output cols, [Cout:] = odd
    """
    hid = w1_ref.shape[0]
    hh = hid // 2

    # Segment-boundary masks, built once and shared by every tap builder.
    pos = pos_ref[...]                     # (1, N)
    at_start = pos == 0                    # first column of each length-L segment
    at_end = pos == seg_len - 1            # last column of each segment

    # h[:, m-1] / h[:, m+1] within each segment, zero at the segment edge.
    # The circular wrap lanes are exactly the masked lanes, so this is exact.
    def left(h):
        return jnp.where(at_start, 0.0, jnp.roll(h, 1, axis=1))

    def right(h):
        return jnp.where(at_end, 0.0, jnp.roll(h, -1, axis=1))

    # --- Conv1(Cin -> H, k=3, p=1) + Mish --------------------------------
    x = x_ref[...].astype(jnp.bfloat16)                       # cast once, pre-taps
    t1 = jnp.concatenate([left(x), x, right(x)], axis=0)      # (3*Cp, N)
    f = jnp.dot(w1_ref[...], t1, preferred_element_type=jnp.float32)
    f = _mish(f + b1_ref[...]).astype(jnp.bfloat16)           # (H, N)

    # --- Upsample(x2 nearest) folded into Conv2(H -> H/2) + Mish ---------
    #   even cols: W0 @ f[m-1] + (W1+W2) @ f[m]  -> weights w2[:hh], taps t2[:2H]
    #   odd  cols: (W0+W1) @ f[m] + W2 @ f[m+1]  -> weights w2[hh:], taps t2[H:]
    # Two zero-free dots over 16-aligned slices of one shared tap buffer.
    t2 = jnp.concatenate([left(f), f, right(f)], axis=0)      # (3*H, N)
    w2 = w2_ref[...]
    b2 = b2_ref[...]
    qe = _mish(jnp.dot(w2[:hh], t2[:2 * hid],
                       preferred_element_type=jnp.float32) + b2)
    qo = _mish(jnp.dot(w2[hh:], t2[hid:],
                       preferred_element_type=jnp.float32) + b2)
    qe = qe.astype(jnp.bfloat16)                               # (H/2, N)
    qo = qo.astype(jnp.bfloat16)                               # (H/2, N)

    # --- Conv3(H/2 -> Cout) on the de-interleaved length-2L stream -------
    # stream s[2m] = qe[m], s[2m+1] = qo[m]; tap blocks [qo[m-1], qe, qo, qe[m+1]]:
    #   g_even = W0@qo[m-1] + W1@qe[m] + W2@qo[m]
    #   g_odd  = W0@qe[m]   + W1@qo[m] + W2@qe[m+1]
    # One (2*Cout, 4*hh) matmul -> one sublane-aligned (8, N) store.
    t3 = jnp.concatenate([left(qo), qe, qo, right(qe)], axis=0)   # (4*hh, N)
    g = jnp.dot(w3_ref[...], t3, preferred_element_type=jnp.float32)
    g = g + b3_ref[...]                                        # (2*Cout, N)
    if very_bottom:
        g = jnp.tanh(g)    # exact: tanh commutes with the trailing nearest x2
    o_ref[...] = g


def _fold_params(w1, b1, w2, b2, w3, b3, cp):
    """Fold PyTorch-layout Conv1d params (Cout, Cin, 3) into kernel layout."""
    hid, cin, k = w1.shape
    hh = hid // 2
    cout = w3.shape[0]
    assert k == 3 and w2.shape == (hh, hid, 3) and w3.shape == (cout, hh, 3)

    # conv1: tap-major [W_k0 | W_k1 | W_k2], Cin zero-padded to cp.
    w1p = jnp.pad(w1, ((0, 0), (0, cp - cin), (0, 0)))
    w1f = jnp.concatenate([w1p[..., 0], w1p[..., 1], w1p[..., 2]], axis=1)

    # conv2 folded with the mid x2 nearest upsample (zero-free even/odd rows).
    w2e = jnp.concatenate([w2[..., 0], w2[..., 1] + w2[..., 2]], axis=1)  # (hh, 2H)
    w2o = jnp.concatenate([w2[..., 0] + w2[..., 1], w2[..., 2]], axis=1)  # (hh, 2H)
    w2f = jnp.concatenate([w2e, w2o], axis=0)                             # (H, 2H)

    # conv3 against tap blocks [qo[m-1], qe[m], qo[m], qe[m+1]].
    zc = jnp.zeros((cout, hh), w3.dtype)
    w3e = jnp.concatenate([w3[..., 0], w3[..., 1], w3[..., 2], zc], axis=1)
    w3o = jnp.concatenate([zc, w3[..., 0], w3[..., 1], w3[..., 2]], axis=1)
    w3f = jnp.concatenate([w3e, w3o], axis=0)                  # (2*Cout, 4*hh)
    b3f = jnp.concatenate([b3, b3])[:, None]                   # (2*Cout, 1)

    return (w1f.astype(jnp.bfloat16), b1[:, None].astype(jnp.float32),
            w2f.astype(jnp.bfloat16), b2[:, None].astype(jnp.float32),
            w3f.astype(jnp.bfloat16), b3f.astype(jnp.float32))


def _segments_per_step(b, l, max_lanes=1024):
    """How many packed length-L segments each grid step covers on the lane axis."""
    if b * l <= max_lanes:
        return b                          # everything lane-dense in one step
    g = max(1, max_lanes // l)
    while g > 1 and (g * l) % 128:        # per-step lane blocks must be 128-aligned
        g -= 1
    return g if (g * l) % 128 == 0 else b


def decoder2_forward(x_ncl, params, very_bottom=False):
    """Decoder2.forward (num_res_blocks=0). x_ncl: (B, Cin, L) as in PyTorch."""
    w1, b1, w2, b2, w3, b3 = params
    b, cin, l = x_ncl.shape
    hid = w1.shape[0]
    cout = w3.shape[0]
    assert hid % 2 == 0
    assert b1.shape == (hid,) and b2.shape == (hid // 2,) and b3.shape == (cout,)

    # Pad input channels to a multiple of 16 so the in-kernel bf16 sublane
    # concats are (16,128)-tile aligned.
    cp = ((cin + 15) // 16) * 16

    # Pack batch onto the 128-lane axis: (B, Cin, L) -> (Cp, B*L); per-segment
    # boundary masks keep the k=3 taps from crossing batch elements.  Each
    # grid step handles `gseg` segments (all of them at these small shapes).
    gseg = _segments_per_step(b, l)
    steps = -(-b // gseg)                         # cdiv
    bp = steps * gseg
    x = x_ncl.astype(jnp.float32)                 # matches x.float()
    if cp != cin or bp != b:
        x = jnp.pad(x, ((0, bp - b), (0, cp - cin), (0, 0)))
    xp = x.transpose(1, 0, 2).reshape(cp, bp * l)

    # lane % L for one grid step (same pattern every step) -> masks are built
    # once in the kernel, no per-tap broadcasted_iota.
    nl = gseg * l
    pos = jnp.tile(jnp.arange(l, dtype=jnp.int32), gseg)[None, :]   # (1, nl)

    w1f, b1f, w2f, b2f, w3f, b3f = _fold_params(w1, b1, w2, b2, w3, b3, cp)
    hh = hid // 2

    kern = functools.partial(_decoder2_kernel, seg_len=l, very_bottom=very_bottom)
    g = pl.pallas_call(
        kern,
        out_shape=jax.ShapeDtypeStruct((2 * cout, bp * l), jnp.float32),
        grid=(steps,),
        in_specs=[
            pl.BlockSpec((1, nl), lambda i: (0, 0)),             # pos (lane % L)
            pl.BlockSpec((cp, nl), lambda i: (0, i)),            # packed input
            pl.BlockSpec((hid, 3 * cp), lambda i: (0, 0)),       # conv1 weights
            pl.BlockSpec((hid, 1), lambda i: (0, 0)),            # conv1 bias
            pl.BlockSpec((hid, 2 * hid), lambda i: (0, 0)),      # conv2 [even; odd]
            pl.BlockSpec((hh, 1), lambda i: (0, 0)),             # conv2 bias
            pl.BlockSpec((2 * cout, 4 * hh), lambda i: (0, 0)),  # conv3 [even; odd]
            pl.BlockSpec((2 * cout, 1), lambda i: (0, 0)),       # conv3 bias
        ],
        out_specs=pl.BlockSpec((2 * cout, nl), lambda i: (0, i)),
        compiler_params=pltpu.CompilerParams(
            dimension_semantics=("parallel",)),
    )(pos, xp, w1f, b1f, w2f, b2f, w3f, b3f)

    # Unpack lanes -> (B, 2*Cout, L); the final nearest x2 upsample is just the
    # output interleave: out[:, :, 4m+{0,1}] = ge[m], out[:, :, 4m+{2,3}] = go[m].
    # (Downstream consumers that can take the de-interleaved (ge, go) streams
    # directly should do so and skip this interleave.)
    g = g.reshape(2 * cout, bp, l).transpose(1, 0, 2)[:b]
    ge, go = g[:, :cout], g[:, cout:]
    out = jnp.stack([ge, ge, go, go], axis=-1).reshape(b, cout, 4 * l)
    return out


# ---------------------------------------------------------------------------
# Pure-JAX reference (mirrors the PyTorch module op-for-op) for validation.
# ---------------------------------------------------------------------------
def _mish_ref(x):
    return x * jnp.tanh(jax.nn.softplus(x))


def _conv1d_ref(x, w, bias):
    xp = jnp.pad(x, ((0, 0), (0, 0), (1, 1)))
    l = x.shape[2]
    out = bias[None, :, None]
    for k in range(3):
        out = out + jnp.einsum("bcl,oc->bol", xp[:, :, k:k + l], w[:, :, k])
    return out


def _ref_forward(x_ncl, params, very_bottom=False):
    w1, b1, w2, b2, w3, b3 = params
    h = x_ncl.astype(jnp.float32)
    h = _mish_ref(_conv1d_ref(h, w1, b1))
    h = jnp.repeat(h, 2, axis=2)          # Upsample(x2, nearest)
    h = _mish_ref(_conv1d_ref(h, w2, b2))
    h = _conv1d_ref(h, w3, b3)
    h = jnp.repeat(h, 2, axis=2)          # Upsample(x2, nearest)
    if very_bottom:
        h = jnp.tanh(h)
    return h


if __name__ == "__main__":
    # in_feat_dim=4, hidden_dim=32, out_feat_dim=4, batch=2, seq len=16.
    B, Cin, L = 2, 4, 16
    hidden, Cout = 32, 4

    key = jax.random.PRNGKey(0)
    k1, k2, k3, k4, k5, k6, kx = jax.random.split(key, 7)
    # PyTorch Conv1d layout: weight (Cout, Cin, k), bias (Cout,).
    w1 = 0.1 * jax.random.normal(k1, (hidden, Cin, 3), jnp.float32)
    b1 = 0.1 * jax.random.normal(k2, (hidden,), jnp.float32)
    w2 = 0.1 * jax.random.normal(k3, (hidden // 2, hidden, 3), jnp.float32)
    b2 = 0.1 * jax.random.normal(k4, (hidden // 2,), jnp.float32)
    w3 = 0.1 * jax.random.normal(k5, (Cout, hidden // 2, 3), jnp.float32)
    b3 = 0.1 * jax.random.normal(k6, (Cout,), jnp.float32)
    x = jax.random.normal(kx, (B, Cin, L), jnp.float32)       # NCL input
    params = (w1, b1, w2, b2, w3, b3)

    for vb in (False, True):
        fwd = jax.jit(functools.partial(decoder2_forward, very_bottom=vb))
        out = jax.block_until_ready(fwd(x, params))
        assert out.shape == (B, Cout, 4 * L), out.shape
        assert out.dtype == jnp.float32
        ref = _ref_forward(x, params, very_bottom=vb)
        err = float(jnp.max(jnp.abs(out - ref)))
        assert err < 5e-2, f"very_bottom={vb}: max abs err {err}"

    print("KERNEL_OK")
</pallas_src>

<mosaic_0001>
module attributes {stable_mosaic.version = 11 : i64} {
  func.func @_decoder2_kernel(%arg0: i32, %arg1: memref<1x32xi32, #tpu.memory_space<vmem>>, %arg2: memref<16x32xf32, #tpu.memory_space<vmem>>, %arg3: memref<32x48xbf16, #tpu.memory_space<vmem>>, %arg4: memref<32x1xf32, #tpu.memory_space<vmem>>, %arg5: memref<32x64xbf16, #tpu.memory_space<vmem>>, %arg6: memref<16x1xf32, #tpu.memory_space<vmem>>, %arg7: memref<8x64xbf16, #tpu.memory_space<vmem>>, %arg8: memref<8x1xf32, #tpu.memory_space<vmem>>, %arg9: memref<8x32xf32, #tpu.memory_space<vmem>>) attributes {dimension_semantics = [#tpu.dimension_semantics<parallel>], iteration_bounds = array<i64: 1>, scalar_prefetch = 0 : i64, scratch_operands = 0 : i64, tpu.core_type = #tpu.core_type<tc>, window_params = [{pipeline_mode = #tpu.pipeline_mode<synchronous>, transform_indices = @transform_0, window_bounds = array<i64: 1, 32>}, {transform_indices = @transform_1, window_bounds = array<i64: 16, 32>}, {pipeline_mode = #tpu.pipeline_mode<synchronous>, transform_indices = @transform_2, window_bounds = array<i64: 32, 48>}, {pipeline_mode = #tpu.pipeline_mode<synchronous>, transform_indices = @transform_3, window_bounds = array<i64: 32, 1>}, {pipeline_mode = #tpu.pipeline_mode<synchronous>, transform_indices = @transform_4, window_bounds = array<i64: 32, 64>}, {pipeline_mode = #tpu.pipeline_mode<synchronous>, transform_indices = @transform_5, window_bounds = array<i64: 16, 1>}, {pipeline_mode = #tpu.pipeline_mode<synchronous>, transform_indices = @transform_6, window_bounds = array<i64: 8, 64>}, {pipeline_mode = #tpu.pipeline_mode<synchronous>, transform_indices = @transform_7, window_bounds = array<i64: 8, 1>}, {transform_indices = @transform_8, window_bounds = array<i64: 8, 32>}]} {
    %c0 = arith.constant 0 : index
    %c0_0 = arith.constant 0 : index
    %0 = vector.load %arg1[%c0, %c0_0] : memref<1x32xi32, #tpu.memory_space<vmem>>, vector<1x32xi32>
    %c0_i32 = arith.constant 0 : i32
    %1 = vector.broadcast %c0_i32 : i32 to vector<1x32xi32>
    %2 = arith.cmpi eq, %0, %1 : vector<1x32xi32>
    %c15_i32 = arith.constant 15 : i32
    %3 = vector.broadcast %c15_i32 : i32 to vector<1x32xi32>
    %4 = arith.cmpi eq, %0, %3 : vector<1x32xi32>
    %c0_1 = arith.constant 0 : index
    %c0_2 = arith.constant 0 : index
    %5 = vector.load %arg2[%c0_1, %c0_2] : memref<16x32xf32, #tpu.memory_space<vmem>>, vector<16x32xf32>
    %6 = arith.truncf %5 : vector<16x32xf32> to vector<16x32xbf16>
    %7 = vector.extract_strided_slice %6 {offsets = [0, 31], sizes = [16, 1], strides = [1, 1]} : vector<16x32xbf16> to vector<16x1xbf16>
    %8 = vector.extract_strided_slice %6 {offsets = [0, 0], sizes = [16, 31], strides = [1, 1]} : vector<16x32xbf16> to vector<16x31xbf16>
    %9 = tpu.concatenate %7, %8 in 1 : vector<16x1xbf16>, vector<16x31xbf16> -> vector<16x32xbf16>
    %cst = arith.constant 0.000000e+00 : f32
    %10 = arith.truncf %cst : f32 to bf16
    %11 = vector.shape_cast %2 : vector<1x32xi1> to vector<1x32xi1>
    %12 = vector.broadcast %11 : vector<1x32xi1> to vector<16x32xi1>
    %13 = vector.broadcast %10 : bf16 to vector<16x32xbf16>
    %14 = arith.select %12, %13, %9 : vector<16x32xi1>, vector<16x32xbf16>
    %15 = vector.extract_strided_slice %6 {offsets = [0, 1], sizes = [16, 31], strides = [1, 1]} : vector<16x32xbf16> to vector<16x31xbf16>
    %16 = vector.extract_strided_slice %6 {offsets = [0, 0], sizes = [16, 1], strides = [1, 1]} : vector<16x32xbf16> to vector<16x1xbf16>
    %17 = tpu.concatenate %15, %16 in 1 : vector<16x31xbf16>, vector<16x1xbf16> -> vector<16x32xbf16>
    %cst_3 = arith.constant 0.000000e+00 : f32
    %18 = arith.truncf %cst_3 : f32 to bf16
    %19 = vector.shape_cast %4 : vector<1x32xi1> to vector<1x32xi1>
    %20 = vector.broadcast %19 : vector<1x32xi1> to vector<16x32xi1>
    %21 = vector.broadcast %18 : bf16 to vector<16x32xbf16>
    %22 = arith.select %20, %21, %17 : vector<16x32xi1>, vector<16x32xbf16>
    %23 = tpu.concatenate %14, %6, %22 in 0 : vector<16x32xbf16>, vector<16x32xbf16>, vector<16x32xbf16> -> vector<48x32xbf16>
    %c0_4 = arith.constant 0 : index
    %c0_5 = arith.constant 0 : index
    %24 = vector.load %arg3[%c0_4, %c0_5] : memref<32x48xbf16, #tpu.memory_space<vmem>>, vector<32x48xbf16>
    %cst_6 = arith.constant dense<0.000000e+00> : vector<32x32xf32>
    %25 = tpu.matmul %24, %23, %cst_6 {dimension_numbers = #tpu.dot_dimension_numbers<[1], [0], [0], [1], [0, 0, 1, 1], [], []>} : vector<32x48xbf16>, vector<48x32xbf16>, vector<32x32xf32> -> vector<32x32xf32>
    %c0_7 = arith.constant 0 : index
    %c0_8 = arith.constant 0 : index
    %26 = vector.load %arg4[%c0_7, %c0_8] : memref<32x1xf32, #tpu.memory_space<vmem>>, vector<32x1xf32>
    %27 = vector.broadcast %26 : vector<32x1xf32> to vector<32x32xf32>
    %28 = arith.addf %25, %27 : vector<32x32xf32>
    %cst_9 = arith.constant 2.000000e+01 : f32
    %29 = vector.broadcast %cst_9 : f32 to vector<32x32xf32>
    %30 = arith.minimumf %28, %29 : vector<32x32xf32>
    %31 = math.exp %30 : vector<32x32xf32>
    %cst_10 = arith.constant 2.000000e+00 : f32
    %32 = vector.broadcast %cst_10 : f32 to vector<32x32xf32>
    %33 = arith.addf %31, %32 : vector<32x32xf32>
    %34 = arith.mulf %31, %33 : vector<32x32xf32>
    %cst_11 = arith.constant 2.000000e+00 : f32
    %35 = vector.broadcast %cst_11 : f32 to vector<32x32xf32>
    %36 = arith.addf %34, %35 : vector<32x32xf32>
    %37 = arith.divf %34, %36 : vector<32x32xf32>
    %38 = arith.mulf %28, %37 : vector<32x32xf32>
    %39 = arith.truncf %38 : vector<32x32xf32> to vector<32x32xbf16>
    %40 = vector.extract_strided_slice %39 {offsets = [0, 31], sizes = [32, 1], strides = [1, 1]} : vector<32x32xbf16> to vector<32x1xbf16>
    %41 = vector.extract_strided_slice %39 {offsets = [0, 0], sizes = [32, 31], strides = [1, 1]} : vector<32x32xbf16> to vector<32x31xbf16>
    %42 = tpu.concatenate %40, %41 in 1 : vector<32x1xbf16>, vector<32x31xbf16> -> vector<32x32xbf16>
    %cst_12 = arith.constant 0.000000e+00 : f32
    %43 = arith.truncf %cst_12 : f32 to bf16
    %44 = vector.shape_cast %2 : vector<1x32xi1> to vector<1x32xi1>
    %45 = vector.broadcast %44 : vector<1x32xi1> to vector<32x32xi1>
    %46 = vector.broadcast %43 : bf16 to vector<32x32xbf16>
    %47 = arith.select %45, %46, %42 : vector<32x32xi1>, vector<32x32xbf16>
    %48 = vector.extract_strided_slice %39 {offsets = [0, 1], sizes = [32, 31], strides = [1, 1]} : vector<32x32xbf16> to vector<32x31xbf16>
    %49 = vector.extract_strided_slice %39 {offsets = [0, 0], sizes = [32, 1], strides = [1, 1]} : vector<32x32xbf16> to vector<32x1xbf16>
    %50 = tpu.concatenate %48, %49 in 1 : vector<32x31xbf16>, vector<32x1xbf16> -> vector<32x32xbf16>
    %cst_13 = arith.constant 0.000000e+00 : f32
    %51 = arith.truncf %cst_13 : f32 to bf16
    %52 = vector.shape_cast %4 : vector<1x32xi1> to vector<1x32xi1>
    %53 = vector.broadcast %52 : vector<1x32xi1> to vector<32x32xi1>
    %54 = vector.broadcast %51 : bf16 to vector<32x32xbf16>
    %55 = arith.select %53, %54, %50 : vector<32x32xi1>, vector<32x32xbf16>
    %56 = tpu.concatenate %47, %39, %55 in 0 : vector<32x32xbf16>, vector<32x32xbf16>, vector<32x32xbf16> -> vector<96x32xbf16>
    %c0_14 = arith.constant 0 : index
    %c0_15 = arith.constant 0 : index
    %57 = vector.load %arg5[%c0_14, %c0_15] : memref<32x64xbf16, #tpu.memory_space<vmem>>, vector<32x64xbf16>
    %c0_16 = arith.constant 0 : index
    %c0_17 = arith.constant 0 : index
    %58 = vector.load %arg6[%c0_16, %c0_17] : memref<16x1xf32, #tpu.memory_space<vmem>>, vector<16x1xf32>
    %59 = vector.extract_strided_slice %57 {offsets = [0, 0], sizes = [16, 64], strides = [1, 1]} : vector<32x64xbf16> to vector<16x64xbf16>
    %60 = vector.extract_strided_slice %56 {offsets = [0, 0], sizes = [64, 32], strides = [1, 1]} : vector<96x32xbf16> to vector<64x32xbf16>
    %cst_18 = arith.constant dense<0.000000e+00> : vector<16x32xf32>
    %61 = tpu.matmul %59, %60, %cst_18 {dimension_numbers = #tpu.dot_dimension_numbers<[1], [0], [0], [1], [0, 0, 1, 1], [], []>} : vector<16x64xbf16>, vector<64x32xbf16>, vector<16x32xf32> -> vector<16x32xf32>
    %62 = vector.broadcast %58 : vector<16x1xf32> to vector<16x32xf32>
    %63 = arith.addf %61, %62 : vector<16x32xf32>
    %cst_19 = arith.constant 2.000000e+01 : f32
    %64 = vector.broadcast %cst_19 : f32 to vector<16x32xf32>
    %65 = arith.minimumf %63, %64 : vector<16x32xf32>
    %66 = math.exp %65 : vector<16x32xf32>
    %cst_20 = arith.constant 2.000000e+00 : f32
    %67 = vector.broadcast %cst_20 : f32 to vector<16x32xf32>
    %68 = arith.addf %66, %67 : vector<16x32xf32>
    %69 = arith.mulf %66, %68 : vector<16x32xf32>
    %cst_21 = arith.constant 2.000000e+00 : f32
    %70 = vector.broadcast %cst_21 : f32 to vector<16x32xf32>
    %71 = arith.addf %69, %70 : vector<16x32xf32>
    %72 = arith.divf %69, %71 : vector<16x32xf32>
    %73 = arith.mulf %63, %72 : vector<16x32xf32>
    %74 = vector.extract_strided_slice %57 {offsets = [16, 0], sizes = [16, 64], strides = [1, 1]} : vector<32x64xbf16> to vector<16x64xbf16>
    %75 = vector.extract_strided_slice %56 {offsets = [32, 0], sizes = [64, 32], strides = [1, 1]} : vector<96x32xbf16> to vector<64x32xbf16>
    %cst_22 = arith.constant dense<0.000000e+00> : vector<16x32xf32>
    %76 = tpu.matmul %74, %75, %cst_22 {dimension_numbers = #tpu.dot_dimension_numbers<[1], [0], [0], [1], [0, 0, 1, 1], [], []>} : vector<16x64xbf16>, vector<64x32xbf16>, vector<16x32xf32> -> vector<16x32xf32>
    %77 = vector.broadcast %58 : vector<16x1xf32> to vector<16x32xf32>
    %78 = arith.addf %76, %77 : vector<16x32xf32>
    %cst_23 = arith.constant 2.000000e+01 : f32
    %79 = vector.broadcast %cst_23 : f32 to vector<16x32xf32>
    %80 = arith.minimumf %78, %79 : vector<16x32xf32>
    %81 = math.exp %80 : vector<16x32xf32>
    %cst_24 = arith.constant 2.000000e+00 : f32
    %82 = vector.broadcast %cst_24 : f32 to vector<16x32xf32>
    %83 = arith.addf %81, %82 : vector<16x32xf32>
    %84 = arith.mulf %81, %83 : vector<16x32xf32>
    %cst_25 = arith.constant 2.000000e+00 : f32
    %85 = vector.broadcast %cst_25 : f32 to vector<16x32xf32>
    %86 = arith.addf %84, %85 : vector<16x32xf32>
    %87 = arith.divf %84, %86 : vector<16x32xf32>
    %88 = arith.mulf %78, %87 : vector<16x32xf32>
    %89 = arith.truncf %73 : vector<16x32xf32> to vector<16x32xbf16>
    %90 = arith.truncf %88 : vector<16x32xf32> to vector<16x32xbf16>
    %91 = vector.extract_strided_slice %90 {offsets = [0, 31], sizes = [16, 1], strides = [1, 1]} : vector<16x32xbf16> to vector<16x1xbf16>
    %92 = vector.extract_strided_slice %90 {offsets = [0, 0], sizes = [16, 31], strides = [1, 1]} : vector<16x32xbf16> to vector<16x31xbf16>
    %93 = tpu.concatenate %91, %92 in 1 : vector<16x1xbf16>, vector<16x31xbf16> -> vector<16x32xbf16>
    %cst_26 = arith.constant 0.000000e+00 : f32
    %94 = arith.truncf %cst_26 : f32 to bf16
    %95 = vector.shape_cast %2 : vector<1x32xi1> to vector<1x32xi1>
    %96 = vector.broadcast %95 : vector<1x32xi1> to vector<16x32xi1>
    %97 = vector.broadcast %94 : bf16 to vector<16x32xbf16>
    %98 = arith.select %96, %97, %93 : vector<16x32xi1>, vector<16x32xbf16>
    %99 = vector.extract_strided_slice %89 {offsets = [0, 1], sizes = [16, 31], strides = [1, 1]} : vector<16x32xbf16> to vector<16x31xbf16>
    %100 = vector.extract_strided_slice %89 {offsets = [0, 0], sizes = [16, 1], strides = [1, 1]} : vector<16x32xbf16> to vector<16x1xbf16>
    %101 = tpu.concatenate %99, %100 in 1 : vector<16x31xbf16>, vector<16x1xbf16> -> vector<16x32xbf16>
    %cst_27 = arith.constant 0.000000e+00 : f32
    %102 = arith.truncf %cst_27 : f32 to bf16
    %103 = vector.shape_cast %4 : vector<1x32xi1> to vector<1x32xi1>
    %104 = vector.broadcast %103 : vector<1x32xi1> to vector<16x32xi1>
    %105 = vector.broadcast %102 : bf16 to vector<16x32xbf16>
    %106 = arith.select %104, %105, %101 : vector<16x32xi1>, vector<16x32xbf16>
    %107 = tpu.concatenate %98, %89, %90, %106 in 0 : vector<16x32xbf16>, vector<16x32xbf16>, vector<16x32xbf16>, vector<16x32xbf16> -> vector<64x32xbf16>
    %c0_28 = arith.constant 0 : index
    %c0_29 = arith.constant 0 : index
    %108 = vector.load %arg7[%c0_28, %c0_29] : memref<8x64xbf16, #tpu.memory_space<vmem>>, vector<8x64xbf16>
    %cst_30 = arith.constant dense<0.000000e+00> : vector<8x32xf32>
    %109 = tpu.matmul %108, %107, %cst_30 {dimension_numbers = #tpu.dot_dimension_numbers<[1], [0], [0], [1], [0, 0, 1, 1], [], []>} : vector<8x64xbf16>, vector<64x32xbf16>, vector<8x32xf32> -> vector<8x32xf32>
    %c0_31 = arith.constant 0 : index
    %c0_32 = arith.constant 0 : index
    %110 = vector.load %arg8[%c0_31, %c0_32] : memref<8x1xf32, #tpu.memory_space<vmem>>, vector<8x1xf32>
    %111 = vector.broadcast %110 : vector<8x1xf32> to vector<8x32xf32>
    %112 = arith.addf %109, %111 : vector<8x32xf32>
    %c0_33 = arith.constant 0 : index
    %c0_34 = arith.constant 0 : index
    %113 = vector.load %arg9[%c0_33, %c0_34] : memref<8x32xf32, #tpu.memory_space<vmem>>, vector<8x32xf32>
    tpu.vector_store %arg9[%c0_33, %c0_34], %112 {strides = array<i32>} : memref<8x32xf32, #tpu.memory_space<vmem>>, vector<8x32xf32>,
    return
  }
  func.func @transform_0(%arg0: i32) -> (i32, i32) {
    %c0_i32 = arith.constant 0 : i32
    %c0_i32_0 = arith.constant 0 : i32
    %c0_i32_1 = arith.constant 0 : i32
    return %c0_i32, %c0_i32_0 : i32, i32
  }
  func.func @transform_1(%arg0: i32) -> (i32, i32) {
    %c0_i32 = arith.constant 0 : i32
    %c0_i32_0 = arith.constant 0 : i32
    return %c0_i32, %arg0 : i32, i32
  }
  func.func @transform_2(%arg0: i32) -> (i32, i32) {
    %c0_i32 = arith.constant 0 : i32
    %c0_i32_0 = arith.constant 0 : i32
    %c0_i32_1 = arith.constant 0 : i32
    return %c0_i32, %c0_i32_0 : i32, i32
  }
  func.func @transform_3(%arg0: i32) -> (i32, i32) {
    %c0_i32 = arith.constant 0 : i32
    %c0_i32_0 = arith.constant 0 : i32
    %c0_i32_1 = arith.constant 0 : i32
    return %c0_i32, %c0_i32_0 : i32, i32
  }
  func.func @transform_4(%arg0: i32) -> (i32, i32) {
    %c0_i32 = arith.constant 0 : i32
    %c0_i32_0 = arith.constant 0 : i32
    %c0_i32_1 = arith.constant 0 : i32
    return %c0_i32, %c0_i32_0 : i32, i32
  }
  func.func @transform_5(%arg0: i32) -> (i32, i32) {
    %c0_i32 = arith.constant 0 : i32
    %c0_i32_0 = arith.constant 0 : i32
    %c0_i32_1 = arith.constant 0 : i32
    return %c0_i32, %c0_i32_0 : i32, i32
  }
  func.func @transform_6(%arg0: i32) -> (i32, i32) {
    %c0_i32 = arith.constant 0 : i32
    %c0_i32_0 = arith.constant 0 : i32
    %c0_i32_1 = arith.constant 0 : i32
    return %c0_i32, %c0_i32_0 : i32, i32
  }
  func.func @transform_7(%arg0: i32) -> (i32, i32) {
    %c0_i32 = arith.constant 0 : i32
    %c0_i32_0 = arith.constant 0 : i32
    %c0_i32_1 = arith.constant 0 : i32
    return %c0_i32, %c0_i32_0 : i32, i32
  }
  func.func @transform_8(%arg0: i32) -> (i32, i32) {
    %c0_i32 = arith.constant 0 : i32
    %c0_i32_0 = arith.constant 0 : i32
    return %c0_i32, %arg0 : i32, i32
  }
}

</mosaic_0001>

<bundles_post_ra>
// kernel: tile.9
= control target key start
LH: loop header
LB: loop body
LE: loop exit
PB: predicated region body
PF: predicated region fallthrough
CT: control target
= control target key end

     0   :  { %vm7_vm0 = vcmask 130048   ;;  %vm13_vm1 = vcmask 261248   ;;  %s39_s0 = inlined_call_operand.vmem [shape: s32[2,16], index: 0, kind: input, shape index: {}]   ;;  %s40_s1 = inlined_call_operand.vmem [shape: s32[1,32], index: 1, kind: output, shape index: {}]  }
   0x1   :  { %v4_v0 = vld [vmem:[%s39_s0] sm:$0x3]  ;;  %s22_s0 = smov 16  }
   0x2   :  { %5 = vst [vmem:[#allocation1] sm:$0x3] %v4_v0 }
   0x9   :  { %v10_v1 = vld [vmem:[#allocation1 + $0x1] sm:$0x1]   ;;  %v6_v2 = vld [vmem:[#allocation1] sm:$0x1]  }
   0xa   :  { %11 = vrot.lane.b32.xlu0 %v10_v1, %s22_s0  ;;  %8 = vst.msk [vmem:[#allocation0] sm:$0x1] %vm7_vm0, %v6_v2  }
  0x7c   :  { %v12_v3 = vpop.permute.xlu0 %11  }
  0x7d   :  { %14 = vst.msk [vmem:[#allocation0] sm:$0x1] %vm13_vm1, %v12_v3  }
  0x84   :  { %v18_v4 = vld [vmem:[#allocation0] sm:$0x1] }
  0x85   :  { %20 = vst [vmem:[%s40_s1] sm:$0x1] %v18_v4 }

// kernel: decoder2_forward.1
= control target key start
LH: loop header
LB: loop body
LE: loop exit
PB: predicated region body
PF: predicated region fallthrough
CT: control target
= control target key end

     0   :  { %v622_v2 = vmov 0   ;;  %s623_s9 = smov 97   ;;  %s624_s10 = smov 127   ;;  %vm123_vm0 = vcmask 392192   ;;  %v49_v9 = vlaneseq  ;;  %vm43_vm7 = vcmask 7168   ;;  %s797_s1 = inlined_call_operand.vmem [shape: f32[16,32], index: 1, kind: input, shape index: {}]   ;;  %s798_s2 = inlined_call_operand.vmem [shape: bf16[32,48], index: 2, kind: input, shape index: {}]   ;;  %s799_s3 = inlined_call_operand.vmem [shape: f32[32,1], index: 3, kind: input, shape index: {}]   ;;  %s800_s0 = inlined_call_operand.vmem [shape: s32[1,32], index: 0, kind: input, shape index: {}]   ;;  %s801_s4 = inlined_call_operand.vmem [shape: bf16[32,64], index: 4, kind: input, shape index: {}]   ;;  %s802_s5 = inlined_call_operand.vmem [shape: f32[16,1], index: 5, kind: input, shape index: {}]   ;;  %s803_s7 = inlined_call_operand.vmem [shape: f32[8,1], index: 7, kind: input, shape index: {}]   ;;  %s804_s6 = inlined_call_operand.vmem [shape: bf16[8,64], index: 6, kind: input, shape index: {}]   ;;  %s805_s8 = inlined_call_operand.vmem [shape: f32[8,32], index: 8, kind: output, shape index: {}]  }
   0x1   :  { %v35_v0 = vld [vmem:[%s797_s1] sm:$0xff]  ;;  %v36_v1 = vld [vmem:[%s797_s1 + $0x8] sm:$0xff]  ;;  %585 = vset.pattern.permute.xlu1 %v622_v2  ;;  %584 = vset.pattern.permute.xlu0 %v622_v2  ;;  %s625_s13 = smov 1   ;;  %s626_s1 = smov 31   ;;  %v91_v7 = vld [vmem:[%s799_s3 + $0x10] sm:$0xff]  ;;  %vm66_vm9 = vcmask 252928  }
   0x2   :  { %v37_v3 = vpack.c.bf16 %v36_v1, %v35_v0  ;;  %v586_v4 = vld [vmem:[%s798_s2] sm:$0xff]   ;;  %v90_v5 = vld [vmem:[%s799_s3 + $0x8] sm:$0xff]  ;;  %v92_v8 = vld [vmem:[%s799_s3 + $0x18] sm:$0xff]  ;;  %v50_v11 = vshrl.u32 %v49_v9, 7  ;;  %v627_v30 = vmov 0.0   ;;  %vm628_vm11 = vmmov 0  }
   0x3   :  { %537 = vmatprep.mubr.msk.bf16.mxu0 %vm123_vm0, %v586_v4  ;;  %v89_v6 = vld [vmem:[%s799_s3] sm:$0xff]  ;;  %v587_v29 = vld [vmem:[%s798_s2 + $0x8] sm:$0xff]   ;;  %541 = vmatprep.subr.bf16.mxu1 %v627_v30  ;;  %vm276_vm12 = vcmask 523264   ;;  %vm478_vm13 = vcmask 261120  }
   0x4   :  { %39 = vrot.lane.b32.xlu0 %v37_v3, %s623_s9  ;;  %62 = vrot.lane.b32.xlu1 %v37_v3, %s624_s10  ;;  %v32_v10 = vld [vmem:[%s800_s0] sm:$0x1]  ;;  %v51_v12 = vsub.s32 0, %v50_v11 }
   0x5   :  { %vm33_vm1 = vcmp.eq.s32.totalorder %v32_v10, 0  ;;  %vm34_vm2 = vcmp.eq.s32.totalorder %v32_v10, 15  ;;  %549 = vmatprep.mubr.msk.bf16.mxu1 %vm628_vm11, %v627_v30  ;;  %v428_v22 = vld [vmem:[%s804_s6] sm:$0xf] }
   0x6   :  { %v48_v13 = vsel %vm33_vm1, 1, %v622_v2  ;;  %v71_v15 = vsel %vm34_vm2, 1, %v622_v2 }
   0x7   :  { %v52_v14 = vrot.slane %v48_v13, %v51_v12  ;;  %v75_v16 = vrot.slane %v71_v15, %v51_v12 }
   0x8   :  { %41 = vrot.lane.b32.xlu0 %v37_v3, %s625_s13  ;;  %64 = vrot.lane.b32.xlu1 %v37_v3, %s626_s1 }
   0x9   :  { %vm53_vm3 = vcmp.eq.s32.totalorder %v52_v14, 1  ;;  %vm76_vm5 = vcmp.eq.s32.totalorder %v75_v16, 1 }
   0xa   :  { %vm54_vm4 = vmpackc.low %vm53_vm3, %vm53_vm3 }
   0xb   :  { %v55_v17 = vsel %vm54_vm4, 65537, %v622_v2  ;;  %vm77_vm6 = vmpackc.low %vm76_vm5, %vm76_vm5 }
   0xc   :  { %100 = vperm.xlu1 %585, %v90_v5   ;;  %95 = vperm.xlu0 %584, %v89_v6   ;;  %v59_v18 = vrot.slane %v55_v17, %v51_v12  ;;  %v78_v21 = vsel %vm77_vm6, 65537, %v622_v2  ;;  %v260_v17 = vld [vmem:[%s802_s5 + $0x8] sm:$0xff] }
   0xd   :  { %v82_v25 = vrot.slane %v78_v21, %v51_v12 }
   0xe   :  { %vm703_vm8 = vcmp.eq.s16.totalorder %v59_v18, 0  ;;  %v259_v18 = vld [vmem:[%s802_s5] sm:$0xff] }
   0xf   :  { %vm712_vm10 = vcmp.eq.s16.totalorder %v82_v25, 0 }
  0x10   :  { %105 = vperm.xlu1 %585, %v91_v7   ;;  %110 = vperm.xlu0 %584, %v92_v8  }
  0x76   :  { %v40_v19 = vpop.permute.xlu0 %39  ;;  %v63_v20 = vpop.permute.xlu1 %62 }
  0x7a   :  { %v42_v23 = vpop.permute.xlu0 %41  ;;  %v65_v26 = vpop.permute.xlu1 %64 }
  0x7b   :  { %v46_v24 = vsel %vm43_vm7, %v40_v19, %v42_v23  ;;  %v69_v28 = vsel %vm66_vm9, %v63_v20, %v65_v26 }
  0x7c   :  { %531 = vmatprep.subr.msk.bf16.mxu0 %vm703_vm8, %v46_v24 }
  0x7d   :  { %532 = vmatpush3.bf16.msk.msra.mxu0 %vm703_vm8, %v46_v24 }
  0x7e   :  { %533 = vmatprep.subr.bf16.mxu0 %v37_v3 }
  0x81   :  { %534 = vmatpush3.bf16.msra.mxu0 %v37_v3 }
  0x82   :  { %535 = vmatprep.subr.msk.bf16.mxu0 %vm712_vm10, %v69_v28 }
  0x85   :  { %536 = vmatpush3.bf16.msk.msra.mxu0 %vm712_vm10, %v69_v28 }
  0x86   :  { %553 = vmatprep.subr.bf16.mxu0 %v627_v30 }
  0x88   :  { %538 = vmatmul.mubr.msk.bf16.vlgmr.msra.gmra.mrb[0].mxu0 %vm123_vm0, %v587_v29 }
  0x89   :  { %561 = vmatprep.mubr.msk.bf16.mxu0 %vm628_vm11, %v627_v30 }
  0x8b   :  { %v101_v31 = vpop.permute.xlu1 %100  ;;  %v96_v32 = vpop.permute.xlu0 %95 }
  0x8f   :  { %v106_v33 = vpop.permute.xlu1 %105  ;;  %v111_v37 = vpop.permute.xlu0 %110 }
 0x15b   :  { %v539_v34 = vpop.f32.mrb[0].mxu0 }
 0x15c   :  { %v173_v35 = vadd.f32 %v539_v34, %v106_v33  ;;  %v164_v36 = vpop.f32.mrb[1].mxu0 }
 0x15d   :  { %v165_v38 = vadd.f32 %v164_v36, %v96_v32  ;;  %v540_v39 = vpop.f32.mrb[2].mxu0 }
 0x15e   :  { %v181_v40 = vmin.f32 %v173_v35, 20.0  ;;  %v176_v41 = vadd.f32 %v540_v39, %v111_v37  ;;  %v167_v42 = vpop.f32.mrb[3].mxu0 }
 0x15f   :  { %v179_v43 = vmin.f32 %v165_v38, 20.0  ;;  %v168_v44 = vadd.f32 %v167_v42, %v101_v31  ;;  %v588_v31 = vld [vmem:[%s801_s4 + $0x8] sm:$0xff]  }
 0x160   :  { %v187_v45 = vmul.f32 1.442695, %v181_v40  ;;  %v182_v46 = vmin.f32 %v176_v41, 20.0 }
 0x161   :  { %v183_v47 = vmul.f32 1.442695, %v179_v43  ;;  %v180_v48 = vmin.f32 %v168_v44, 20.0 }
 0x162   :  { %590 = vpow2.f32 %v187_v45  ;;  %v189_v49 = vmul.f32 1.442695, %v182_v46 }
 0x163   :  { %592 = vpow2.f32 %v183_v47  ;;  %v185_v50 = vmul.f32 1.442695, %v180_v48 }
 0x164   :  { %594 = vpow2.f32 %v189_v49 }
 0x165   :  { %596 = vpow2.f32 %v185_v50 }
 0x16c   :  { %v591_v51 = vpop.eup %590 }
 0x16d   :  { %v593_v52 = vpop.eup %592  ;;  %v193_v53 = vadd.f32 2.0, %v591_v51 }
 0x16e   :  { %v595_v54 = vpop.eup %594  ;;  %v191_v55 = vadd.f32 2.0, %v593_v52 }
 0x16f   :  { %v597_v56 = vpop.eup %596  ;;  %v197_v57 = vmul.f32 %v591_v51, %v193_v53  ;;  %v194_v58 = vadd.f32 2.0, %v595_v54 }
 0x170   :  { %v195_v59 = vmul.f32 %v593_v52, %v191_v55  ;;  %v192_v60 = vadd.f32 2.0, %v597_v56 }
 0x171   :  { %v201_v61 = vadd.f32 2.0, %v197_v57  ;;  %v198_v62 = vmul.f32 %v595_v54, %v194_v58 }
 0x172   :  { %v199_v63 = vadd.f32 2.0, %v195_v59  ;;  %v196_v0 = vmul.f32 %v597_v56, %v192_v60 }
 0x173   :  { %598 = vrcp.f32 %v201_v61  ;;  %v202_v1 = vadd.f32 2.0, %v198_v62 }
 0x174   :  { %600 = vrcp.f32 %v199_v63  ;;  %v200_v2 = vadd.f32 2.0, %v196_v0 }
 0x175   :  { %602 = vrcp.f32 %v202_v1 }
 0x176   :  { %604 = vrcp.f32 %v200_v2 }
 0x17d   :  { %v599_v3 = vpop.eup %598 }
 0x17e   :  { %v601_v4 = vpop.eup %600  ;;  %v208_v5 = vmul.f32 %v599_v3, %v197_v57 }
 0x17f   :  { %v603_v6 = vpop.eup %602  ;;  %v204_v7 = vmul.f32 %v601_v4, %v195_v59 }
 0x180   :  { %v605_v8 = vpop.eup %604  ;;  %v210_v9 = vmul.f32 %v603_v6, %v198_v62  ;;  %v213_v11 = vmul.f32 %v208_v5, %v173_v35  ;;  %v589_v35 = vld [vmem:[%s801_s4] sm:$0xff]  }
 0x181   :  { %v206_v10 = vmul.f32 %v605_v8, %v196_v0  ;;  %v211_v13 = vmul.f32 %v204_v7, %v165_v38 }
 0x182   :  { %v214_v12 = vmul.f32 %v210_v9, %v176_v41 }
 0x183   :  { %v212_v14 = vmul.f32 %v206_v10, %v168_v44 }
 0x184   :  { %v216_v15 = vpack.c.bf16 %v214_v12, %v213_v11 }
 0x185   :  { %v215_v16 = vpack.c.bf16 %v212_v14, %v211_v13 }
 0x186   :  { %243 = vrot.lane.b32.xlu0 %v216_v15, %s626_s1  ;;  %239 = vrot.lane.b32.xlu1 %v216_v15, %s624_s10 }
 0x187   :  { %554 = vmatpush3.bf16.msra.mxu0 %v215_v16 }
 0x188   :  { %555 = vmatprep.subr.bf16.mxu0 %v627_v30 }
 0x18a   :  { %241 = vrot.lane.b32.xlu0 %v215_v16, %s626_s1  ;;  %237 = vrot.lane.b32.xlu1 %v215_v16, %s624_s10 }
 0x18b   :  { %556 = vmatpush3.bf16.msra.mxu0 %v216_v15 }
 0x18c   :  { %557 = vmatprep.subr.bf16.mxu0 %v627_v30 }
 0x18e   :  { %223 = vrot.lane.b32.xlu0 %v215_v16, %s625_s13  ;;  %219 = vrot.lane.b32.xlu1 %v215_v16, %s623_s9 }
 0x192   :  { %225 = vrot.lane.b32.xlu0 %v216_v15, %s625_s13  ;;  %221 = vrot.lane.b32.xlu1 %v216_v15, %s623_s9 }
 0x196   :  { %268 = vperm.xlu0 %584, %v260_v17   ;;  %263 = vperm.xlu1 %585, %v259_v18  }
 0x1f8   :  { %v244_v19 = vpop.permute.xlu0 %243  ;;  %v240_v20 = vpop.permute.xlu1 %239 }
 0x1f9   :  { %v251_v28 = vsel %vm66_vm9, %v240_v20, %v244_v19 }
 0x1fc   :  { %v242_v21 = vpop.permute.xlu0 %241  ;;  %v238_v23 = vpop.permute.xlu1 %237 }
 0x1fd   :  { %v247_v24 = vsel %vm66_vm9, %v238_v23, %v242_v21 }
 0x1fe   :  { %558 = vmatpush3.bf16.msk.msra.mxu0 %vm712_vm10, %v247_v24 }
 0x1ff   :  { %559 = vmatprep.subr.bf16.mxu0 %v627_v30 }
 0x200   :  { %v224_v25 = vpop.permute.xlu0 %223  ;;  %v220_v26 = vpop.permute.xlu1 %219 }
 0x201   :  { %v229_v29 = vsel %vm43_vm7, %v220_v26, %v224_v25  ;;  %v429_v25 = vld [vmem:[%s803_s7] sm:$0xff] }
 0x202   :  { %542 = vmatpush3.bf16.msk.msra.mxu1 %vm703_vm8, %v229_v29  ;;  %560 = vmatpush3.bf16.msk.msra.mxu0 %vm712_vm10, %v251_v28 }
 0x203   :  { %543 = vmatprep.subr.bf16.mxu1 %v627_v30 }
 0x204   :  { %v226_v32 = vpop.permute.xlu0 %225  ;;  %v222_v33 = vpop.permute.xlu1 %221 }
 0x205   :  { %v233_v34 = vsel %vm43_vm7, %v222_v33, %v226_v32  ;;  %562 = vmatmul.mubr.msk.bf16.vlgmr.msra.gmra.mrb[4].mxu0 %vm276_vm12, %v588_v31 }
 0x206   :  { %544 = vmatpush3.bf16.msk.msra.mxu1 %vm703_vm8, %v233_v34 }
 0x207   :  { %545 = vmatprep.subr.bf16.mxu1 %v627_v30 }
 0x20a   :  { %546 = vmatpush3.bf16.msra.mxu1 %v215_v16 }
 0x20b   :  { %547 = vmatprep.subr.bf16.mxu1 %v627_v30 }
 0x20e   :  { %548 = vmatpush3.bf16.msra.mxu1 %v216_v15 }
 0x20f   :  { %565 = vmatprep.subr.bf16.mxu1 %v627_v30 }
 0x211   :  { %550 = vmatmul.mubr.msk.bf16.vlgmr.msra.gmra.mrb[0].mxu1 %vm276_vm12, %v589_v35 }
 0x212   :  { %573 = vmatprep.mubr.msk.bf16.mxu1 %vm628_vm11, %v627_v30 }
 0x215   :  { %v264_v36 = vpop.permute.xlu1 %263  ;;  %v269_v40 = vpop.permute.xlu0 %268 }
 0x2d8   :  { %v381_v37 = vpop.f32.mrb[4].mxu0 }
 0x2d9   :  { %v382_v38 = vadd.f32 %v381_v37, %v264_v36  ;;  %v563_v39 = vpop.f32.mrb[5].mxu0 }
 0x2da   :  { %v384_v41 = vpop.f32.mrb[6].mxu0 }
 0x2db   :  { %v388_v42 = vmin.f32 %v382_v38, 20.0  ;;  %v385_v43 = vadd.f32 %v384_v41, %v269_v40  ;;  %v564_v44 = vpop.f32.mrb[7].mxu0 }
 0x2dd   :  { %v390_v45 = vmul.f32 1.442695, %v388_v42  ;;  %v389_v46 = vmin.f32 %v385_v43, 20.0 }
 0x2df   :  { %606 = vpow2.f32 %v390_v45  ;;  %v392_v47 = vmul.f32 1.442695, %v389_v46 }
 0x2e1   :  { %608 = vpow2.f32 %v392_v47 }
 0x2e4   :  { %v314_v48 = vpop.f32.mrb[0].mxu1 }
 0x2e5   :  { %v315_v49 = vadd.f32 %v314_v48, %v264_v36  ;;  %v551_v50 = vpop.f32.mrb[1].mxu1 }
 0x2e6   :  { %v317_v51 = vpop.f32.mrb[2].mxu1 }
 0x2e7   :  { %v321_v52 = vmin.f32 %v315_v49, 20.0  ;;  %v318_v53 = vadd.f32 %v317_v51, %v269_v40  ;;  %v552_v54 = vpop.f32.mrb[3].mxu1 }
 0x2e9   :  { %v607_v55 = vpop.eup %606  ;;  %v323_v56 = vmul.f32 1.442695, %v321_v52  ;;  %v322_v57 = vmin.f32 %v318_v53, 20.0 }
 0x2ea   :  { %v394_v58 = vadd.f32 2.0, %v607_v55 }
 0x2eb   :  { %v609_v59 = vpop.eup %608  ;;  %610 = vpow2.f32 %v323_v56  ;;  %v325_v60 = vmul.f32 1.442695, %v322_v57 }
 0x2ec   :  { %v396_v61 = vmul.f32 %v607_v55, %v394_v58  ;;  %v395_v62 = vadd.f32 2.0, %v609_v59 }
 0x2ed   :  { %612 = vpow2.f32 %v325_v60 }
 0x2ee   :  { %v398_v63 = vadd.f32 2.0, %v396_v61  ;;  %v397_v0 = vmul.f32 %v609_v59, %v395_v62 }
 0x2f0   :  { %614 = vrcp.f32 %v398_v63  ;;  %v399_v1 = vadd.f32 2.0, %v397_v0 }
 0x2f2   :  { %616 = vrcp.f32 %v399_v1 }
 0x2f5   :  { %v611_v2 = vpop.eup %610 }
 0x2f6   :  { %v327_v3 = vadd.f32 2.0, %v611_v2 }
 0x2f7   :  { %v613_v4 = vpop.eup %612 }
 0x2f8   :  { %v329_v5 = vmul.f32 %v611_v2, %v327_v3  ;;  %v328_v6 = vadd.f32 2.0, %v613_v4 }
 0x2fa   :  { %v615_v7 = vpop.eup %614  ;;  %v331_v8 = vadd.f32 2.0, %v329_v5  ;;  %v330_v9 = vmul.f32 %v613_v4, %v328_v6 }
 0x2fb   :  { %v401_v10 = vmul.f32 %v615_v7, %v396_v61 }
 0x2fc   :  { %v617_v11 = vpop.eup %616  ;;  %618 = vrcp.f32 %v331_v8  ;;  %v332_v12 = vadd.f32 2.0, %v330_v9 }
 0x2fd   :  { %v403_v13 = vmul.f32 %v617_v11, %v397_v0  ;;  %v404_v14 = vmul.f32 %v401_v10, %v382_v38 }
 0x2fe   :  { %620 = vrcp.f32 %v332_v12 }
 0x2ff   :  { %v405_v15 = vmul.f32 %v403_v13, %v385_v43 }
 0x301   :  { %v407_v16 = vpack.c.bf16 %v405_v15, %v404_v14 }
 0x303   :  { %411 = vrot.lane.b32.xlu0 %v407_v16, %s625_s13  ;;  %409 = vrot.lane.b32.xlu1 %v407_v16, %s623_s9 }
 0x306   :  { %v619_v17 = vpop.eup %618 }
 0x307   :  { %v334_v18 = vmul.f32 %v619_v17, %v329_v5 }
 0x308   :  { %v621_v19 = vpop.eup %620 }
 0x309   :  { %v336_v20 = vmul.f32 %v621_v19, %v330_v9  ;;  %v337_v21 = vmul.f32 %v334_v18, %v315_v49 }
 0x30b   :  { %v338_v23 = vmul.f32 %v336_v20, %v318_v53 }
 0x30d   :  { %v406_v24 = vpack.c.bf16 %v338_v23, %v337_v21 }
 0x30f   :  { %421 = vrot.lane.b32.xlu0 %v406_v24, %s626_s1  ;;  %419 = vrot.lane.b32.xlu1 %v406_v24, %s624_s10 }
 0x313   :  { %432 = vperm.xlu1 %585, %v429_v25  }
 0x375   :  { %v412_v26 = vpop.permute.xlu0 %411  ;;  %v410_v28 = vpop.permute.xlu1 %409 }
 0x376   :  { %v415_v29 = vsel %vm43_vm7, %v410_v28, %v412_v26 }
 0x377   :  { %566 = vmatpush3.bf16.msk.msra.mxu1 %vm703_vm8, %v415_v29 }
 0x378   :  { %567 = vmatprep.subr.bf16.mxu1 %v627_v30 }
 0x37b   :  { %568 = vmatpush3.bf16.msra.mxu1 %v406_v24 }
 0x37c   :  { %569 = vmatprep.subr.bf16.mxu1 %v627_v30 }
 0x37f   :  { %570 = vmatpush3.bf16.msra.mxu1 %v407_v16 }
 0x380   :  { %571 = vmatprep.subr.bf16.mxu1 %v627_v30 }
 0x381   :  { %v422_v31 = vpop.permute.xlu0 %421  ;;  %v420_v32 = vpop.permute.xlu1 %419 }
 0x382   :  { %v425_v33 = vsel %vm66_vm9, %v420_v32, %v422_v31 }
 0x383   :  { %572 = vmatpush3.bf16.msk.msra.mxu1 %vm712_vm10, %v425_v33 }
 0x386   :  { %574 = vmatmul.mubr.msk.bf16.vlgmr.msra.gmra.mrb[4].mxu1 %vm276_vm12, %v428_v22 }
 0x392   :  { %v433_v34 = vpop.permute.xlu1 %432 }
 0x459   :  { %v472_v35 = vpop.f32.mrb[4].mxu1 }
 0x45a   :  { %v473_v36 = vadd.f32 %v472_v35, %v433_v34  ;;  %v575_v37 = vpop.f32.mrb[5].mxu1 }
 0x45b   :  { %v475_v38 = vpop.f32.mrb[6].mxu1 }
 0x45c   :  { %479 = vst.msk [vmem:[%s805_s8] sm:$0xff] %vm478_vm13, %v473_v36  ;;  %v576_v30 = vpop.f32.mrb[7].mxu1 }

</bundles_post_ra>
